<compile_context>
chip_gen: v7x
topology: tpu7x:2x2x1
jax: 0.10.0
libtpu: 0.0.40
codegen_flags: <defaults>
</compile_context>

<pallas_src>
import functools

import jax
import jax.numpy as jnp
from jax.experimental import pallas as pl
from jax.experimental.pallas import tpu as pltpu

LANE_PAD = 128  # lane-dense rain output slab width (num_layers <= LANE_PAD)


def _relu(x):
    return jnp.maximum(x, 0.0)


def _tanh(x):
    return jnp.tanh(x)


# -----------------------------------------------------------------------------
# Fused forward kernel: one grid step == one "block" (one layer-index l of the
# PyTorch forward).  h persists across blocks in VMEM scratch.
# -----------------------------------------------------------------------------
def _fused_forward_kernel(
        a_ref, x_ref, wemb_ref,
        wx_in_ref, we_in_ref, wr_in_ref,
        wx_pr_ref, we_pr_ref, wr_pr_ref, we_pr0f_ref,
        wx_oh_ref, wx_oe_ref, we_out_ref, wr_out_ref, wrain_ref,
        e_ref, r_ref,
        rain_ref,
        h_sc,
        *, scale):
    l = pl.program_id(0)
    n, _ = h_sc.shape
    lpad = rain_ref.shape[1]

    # Block-0 prologue: embedding (h = X @ W_emb) + zero the padded rain slab.
    @pl.when(l == 0)
    def _():
        h_sc[...] = jnp.dot(x_ref[...], wemb_ref[...],
                            preferred_element_type=jnp.float32)
        rain_ref[...] = jnp.zeros_like(rain_ref)

    a = a_ref[...]               # (N, N)   resident adjacency
    e_l = e_ref[...]             # (N, E)   this block's edge features
    r_l = r_ref[...]             # (N, 1)   this block's rain forcing (hoisted once per block)
    h = h_sc[...]                # (N, H)   carried node state

    def gconv(x, wx, ef, we, wr, act):
        xw = jnp.dot(x, wx, preferred_element_type=jnp.float32)    # MXU
        msg = jnp.dot(a, xw, preferred_element_type=jnp.float32)   # MXU
        fe = jnp.dot(ef, we, preferred_element_type=jnp.float32)   # MXU
        return act(msg + fe + r_l * wr)                            # VPU (+EUP for tanh)

    # --- IN layers (ST_EIConvSPGRAD) ---
    for s in range(scale - 1):
        h = gconv(h, wx_in_ref[s], e_l, we_in_ref[s], wr_in_ref[s], _relu)

    # --- PROP layers (ST_EIConvProp) ---
    # tile(e_l, (1, num_filters)) @ We_pr[0]  ==  e_l @ We_pr0_folded  (folded at param prep)
    efeat_p = gconv(h, wx_pr_ref[0], e_l, we_pr0f_ref[...], wr_pr_ref[0], _tanh)
    # The PyTorch forward re-applies PROP_layers[0] only in the FIRST block.
    # Compute the re-application and blend it in only when l == 0 (tanh output is bounded,
    # so the arithmetic blend is numerically safe).
    efeat_p_dup = gconv(h, wx_pr_ref[0], efeat_p, we_pr_ref[0], wr_pr_ref[0], _tanh)
    use_dup = (l == 0).astype(jnp.float32)
    efeat_p = use_dup * efeat_p_dup + (1.0 - use_dup) * efeat_p
    for s in range(1, scale - 1):
        efeat_p = gconv(h, wx_pr_ref[s], efeat_p, we_pr_ref[s], wr_pr_ref[s], _tanh)

    # --- OUT layer (out_on=True); concat([h, efeat_p]) @ Wx folded into two matmuls ---
    xw = (jnp.dot(h, wx_oh_ref[...], preferred_element_type=jnp.float32)
          + jnp.dot(efeat_p, wx_oe_ref[...], preferred_element_type=jnp.float32))
    msg = jnp.dot(a, xw, preferred_element_type=jnp.float32)
    fe = jnp.dot(e_l, we_out_ref[...], preferred_element_type=jnp.float32)
    h_new = _relu(msg + fe + r_l * wr_out_ref[...])
    h_sc[...] = h_new

    # Per-node rain readout for this block, scattered into lane l of the padded output slab
    # (output block index is constant across the grid -> single dense HBM writeback at the end).
    rain_col = jnp.dot(h_new, wrain_ref[...], preferred_element_type=jnp.float32)   # (N, 1)
    lane = jax.lax.broadcasted_iota(jnp.int32, (n, lpad), 1)
    rain_ref[...] = jnp.where(lane == l, rain_col, rain_ref[...])


def _full_spec(arr):
    """Whole-array block, constant index map: resident in VMEM for the whole grid."""
    nd = arr.ndim
    return pl.BlockSpec(tuple(arr.shape), lambda l: (0,) * nd)


# -----------------------------------------------------------------------------
# Parameters (same construction as before; semantics per the TODO above)
# -----------------------------------------------------------------------------
def init_params(key, *, in_dim, num_hidden, edge_dim, num_filters, scale):
    edge_dim_cat = edge_dim * num_filters
    keys = jax.random.split(key, 64)
    ki = iter(range(64))

    def rnd(shape, scale_val=0.1):
        return (scale_val * jax.random.normal(keys[next(ki)], shape)).astype(jnp.float32)

    params = {"W_emb": rnd((in_dim, num_hidden)), "in_layers": [], "prop_layers": []}
    for _ in range(scale - 1):   # eiconvIN_layers
        params["in_layers"].append({
            "Wx": rnd((num_hidden, num_hidden)),
            "We": rnd((edge_dim, num_hidden)),
            "wr": rnd((1, num_hidden)),
        })
    for _ in range(scale - 1):   # PROP_layers
        params["prop_layers"].append({
            "Wx": rnd((num_hidden, edge_dim_cat)),
            "We": rnd((edge_dim_cat, edge_dim_cat)),
            "wr": rnd((1, edge_dim_cat)),
        })
    params["out_layer"] = {      # eiconvOUT_layers[0] (out_on=True)
        "Wx": rnd((num_hidden + edge_dim_cat, num_hidden)),
        "We": rnd((edge_dim, num_hidden)),
        "wr": rnd((1, num_hidden)),
        "w_rain": rnd((num_hidden, 1)),
    }
    return params


# -----------------------------------------------------------------------------
# Forward: single fused pallas_call
# -----------------------------------------------------------------------------
def forward(params, A, inputs, e_feats, rain0, *, scale, num_layers, num_filters):
    N = A.shape[0]
    in_dim = inputs.shape[1]
    H = params["W_emb"].shape[1]
    E = e_feats.shape[1]
    C = E * num_filters
    S1 = scale - 1
    assert num_layers <= LANE_PAD

    # Host-side layout plumbing only (no compute): block axis leading.
    e_t = jnp.transpose(e_feats, (2, 0, 1))          # (L, N, E)
    r_t = jnp.transpose(rain0, (1, 0))[:, :, None]   # (L, N, 1)

    # Stacked / folded weights.
    wx_in = jnp.stack([p["Wx"] for p in params["in_layers"]])      # (S1, H, H)
    we_in = jnp.stack([p["We"] for p in params["in_layers"]])      # (S1, E, H)
    wr_in = jnp.stack([p["wr"] for p in params["in_layers"]])      # (S1, 1, H)
    wx_pr = jnp.stack([p["Wx"] for p in params["prop_layers"]])    # (S1, H, C)
    we_pr = jnp.stack([p["We"] for p in params["prop_layers"]])    # (S1, C, C)
    wr_pr = jnp.stack([p["wr"] for p in params["prop_layers"]])    # (S1, 1, C)
    # Fold e.repeat(1, num_filters) into PROP_layers[0]'s edge weight:
    we_pr0_fold = we_pr[0].reshape(num_filters, E, C).sum(axis=0)  # (E, C)
    po = params["out_layer"]
    wx_out_h = po["Wx"][:H]                                        # (H, H)
    wx_out_e = po["Wx"][H:]                                        # (C, H)

    # Advisory cost estimate.
    def _gflops(din, ein, dout):
        return 2 * N * (din * dout + N * dout + ein * dout)
    per_block = (S1 * _gflops(H, E, H)
                 + _gflops(H, E, C)
                 + S1 * _gflops(H, C, C)
                 + 2 * N * (H * H + C * H + N * H + E * H)
                 + 2 * N * H)
    cost = pl.CostEstimate(
        flops=int(num_layers * per_block + 2 * N * in_dim * H),
        transcendentals=int(num_layers * (S1 + 1) * N * C),
        bytes_accessed=int(4 * (A.size + inputs.size + e_feats.size + rain0.size
                                + wx_in.size + we_in.size + wr_in.size
                                + wx_pr.size + we_pr.size + wr_pr.size + we_pr0_fold.size
                                + wx_out_h.size + wx_out_e.size + po["We"].size
                                + po["wr"].size + po["w_rain"].size
                                + params["W_emb"].size + N * LANE_PAD)),
    )

    grid_spec = pltpu.PrefetchScalarGridSpec(
        num_scalar_prefetch=0,
        grid=(num_layers,),
        in_specs=[
            _full_spec(A), _full_spec(inputs), _full_spec(params["W_emb"]),
            _full_spec(wx_in), _full_spec(we_in), _full_spec(wr_in),
            _full_spec(wx_pr), _full_spec(we_pr), _full_spec(wr_pr), _full_spec(we_pr0_fold),
            _full_spec(wx_out_h), _full_spec(wx_out_e), _full_spec(po["We"]),
            _full_spec(po["wr"]), _full_spec(po["w_rain"]),
            pl.BlockSpec((None, N, E), lambda l: (l, 0, 0)),   # e_feats, per block
            pl.BlockSpec((None, N, 1), lambda l: (l, 0, 0)),   # rain forcing, per block
        ],
        out_specs=pl.BlockSpec((N, LANE_PAD), lambda l: (0, 0)),
        scratch_shapes=[pltpu.VMEM((N, H), jnp.float32)],      # carried h
    )

    rain_pad = pl.pallas_call(
        functools.partial(_fused_forward_kernel, scale=scale),
        out_shape=jax.ShapeDtypeStruct((N, LANE_PAD), jnp.float32),
        grid_spec=grid_spec,
        compiler_params=pltpu.CompilerParams(
            dimension_semantics=("arbitrary",),     # h / rain carry across blocks
            vmem_limit_bytes=32 * 1024 * 1024,
        ),
        cost_estimate=cost,
    )(A, inputs, params["W_emb"],
      wx_in, we_in, wr_in,
      wx_pr, we_pr, wr_pr, we_pr0_fold,
      wx_out_h, wx_out_e, po["We"], po["wr"], po["w_rain"],
      e_t, r_t)

    return rain_pad[:, :num_layers]


# -----------------------------------------------------------------------------
# Pure-JAX reference (mirrors the PyTorch forward structure, incl. tile/concat)
# -----------------------------------------------------------------------------
def reference_forward(params, A, inputs, e_feats, rain0, *, scale, num_layers, num_filters):
    hp = jax.lax.Precision.HIGHEST
    dot = lambda a, b: jnp.dot(a, b, precision=hp)

    def gconv(h, Wx, ef, We, r, wr, act):
        return act(dot(A, dot(h, Wx)) + dot(ef, We) + r[:, None] * wr)

    h = dot(inputs, params["W_emb"])
    rain_cols = []
    for l in range(num_layers):
        e_l = e_feats[:, :, l]
        r_l = rain0[:, l]
        for s in range(scale - 1):
            p = params["in_layers"][s]
            h = gconv(h, p["Wx"], e_l, p["We"], r_l, p["wr"], lambda x: jnp.maximum(x, 0.0))
        efe = jnp.tile(e_l, (1, num_filters))
        p0 = params["prop_layers"][0]
        efeat_p = gconv(h, p0["Wx"], efe, p0["We"], r_l, p0["wr"], jnp.tanh)
        start = 0 if l == 0 else 1             # first block re-applies PROP_layers[0]
        for s in range(start, scale - 1):
            ps = params["prop_layers"][s]
            efeat_p = gconv(h, ps["Wx"], efeat_p, ps["We"], r_l, ps["wr"], jnp.tanh)
        h_out = jnp.concatenate([h, efeat_p], axis=1)
        po = params["out_layer"]
        h = gconv(h_out, po["Wx"], e_l, po["We"], r_l, po["wr"], lambda x: jnp.maximum(x, 0.0))
        rain_cols.append(dot(h, po["w_rain"]))
    return jnp.concatenate(rain_cols, axis=1)


# -----------------------------------------------------------------------------
# Example run
# -----------------------------------------------------------------------------
if __name__ == "__main__":
    N = 32
    in_dim = 4
    num_hidden = 32
    edge_dim = 4
    num_filters = 2
    scale = 3
    num_layers = 3

    key = jax.random.PRNGKey(0)
    k_in, k_e, k_r, k_p = jax.random.split(key, 4)

    inputs = jax.random.normal(k_in, (N, in_dim), dtype=jnp.float32)
    e_feats = jax.random.normal(k_e, (N, edge_dim, num_layers), dtype=jnp.float32)
    rain0 = jax.random.normal(k_r, (N, num_layers), dtype=jnp.float32)

    # deterministic graph: ring graph with self-loops, row-normalized adjacency
    eye = jnp.eye(N, dtype=jnp.float32)
    A = (eye + jnp.roll(eye, 1, axis=1) + jnp.roll(eye, -1, axis=1)) / 3.0

    params = init_params(k_p, in_dim=in_dim, num_hidden=num_hidden,
                         edge_dim=edge_dim, num_filters=num_filters, scale=scale)

    fwd = jax.jit(functools.partial(forward, scale=scale, num_layers=num_layers,
                                    num_filters=num_filters))
    rain_all = jax.block_until_ready(fwd(params, A, inputs, e_feats, rain0))

    assert rain_all.shape == (N, num_layers), rain_all.shape
    assert bool(jnp.all(jnp.isfinite(rain_all)))

    rain_ref = reference_forward(params, A, inputs, e_feats, rain0,
                                 scale=scale, num_layers=num_layers,
                                 num_filters=num_filters)
    max_err = float(jnp.max(jnp.abs(rain_all - rain_ref)))
    assert max_err < 2e-3, f"max abs err vs reference: {max_err}"
    print("KERNEL_OK")
</pallas_src>

<mosaic_0001>
module attributes {stable_mosaic.version = 11 : i64} {
  func.func @_fused_forward_kernel(%arg0: i32, %arg1: memref<32x32xf32, #tpu.memory_space<vmem>>, %arg2: memref<32x4xf32, #tpu.memory_space<vmem>>, %arg3: memref<4x32xf32, #tpu.memory_space<vmem>>, %arg4: memref<2x32x32xf32, #tpu.memory_space<vmem>>, %arg5: memref<2x4x32xf32, #tpu.memory_space<vmem>>, %arg6: memref<2x1x32xf32, #tpu.memory_space<vmem>>, %arg7: memref<2x32x8xf32, #tpu.memory_space<vmem>>, %arg8: memref<2x8x8xf32, #tpu.memory_space<vmem>>, %arg9: memref<2x1x8xf32, #tpu.memory_space<vmem>>, %arg10: memref<4x8xf32, #tpu.memory_space<vmem>>, %arg11: memref<32x32xf32, #tpu.memory_space<vmem>>, %arg12: memref<8x32xf32, #tpu.memory_space<vmem>>, %arg13: memref<4x32xf32, #tpu.memory_space<vmem>>, %arg14: memref<1x32xf32, #tpu.memory_space<vmem>>, %arg15: memref<32x1xf32, #tpu.memory_space<vmem>>, %arg16: memref<1x32x4xf32, #tpu.memory_space<vmem>>, %arg17: memref<1x32x1xf32, #tpu.memory_space<vmem>>, %arg18: memref<32x128xf32, #tpu.memory_space<vmem>>, %arg19: memref<32x32xf32, #tpu.memory_space<vmem>>) attributes {dimension_semantics = [#tpu.dimension_semantics<arbitrary>], iteration_bounds = array<i64: 3>, scalar_prefetch = 0 : i64, scratch_operands = 1 : i64, tpu.core_type = #tpu.core_type<tc>, window_params = [{pipeline_mode = #tpu.pipeline_mode<synchronous>, transform_indices = @transform_0, window_bounds = array<i64: 32, 32>}, {pipeline_mode = #tpu.pipeline_mode<synchronous>, transform_indices = @transform_1, window_bounds = array<i64: 32, 4>}, {pipeline_mode = #tpu.pipeline_mode<synchronous>, transform_indices = @transform_2, window_bounds = array<i64: 4, 32>}, {pipeline_mode = #tpu.pipeline_mode<synchronous>, transform_indices = @transform_3, window_bounds = array<i64: 2, 32, 32>}, {pipeline_mode = #tpu.pipeline_mode<synchronous>, transform_indices = @transform_4, window_bounds = array<i64: 2, 4, 32>}, {pipeline_mode = #tpu.pipeline_mode<synchronous>, transform_indices = @transform_5, window_bounds = array<i64: 2, 1, 32>}, {pipeline_mode = #tpu.pipeline_mode<synchronous>, transform_indices = @transform_6, window_bounds = array<i64: 2, 32, 8>}, {pipeline_mode = #tpu.pipeline_mode<synchronous>, transform_indices = @transform_7, window_bounds = array<i64: 2, 8, 8>}, {pipeline_mode = #tpu.pipeline_mode<synchronous>, transform_indices = @transform_8, window_bounds = array<i64: 2, 1, 8>}, {pipeline_mode = #tpu.pipeline_mode<synchronous>, transform_indices = @transform_9, window_bounds = array<i64: 4, 8>}, {pipeline_mode = #tpu.pipeline_mode<synchronous>, transform_indices = @transform_10, window_bounds = array<i64: 32, 32>}, {pipeline_mode = #tpu.pipeline_mode<synchronous>, transform_indices = @transform_11, window_bounds = array<i64: 8, 32>}, {pipeline_mode = #tpu.pipeline_mode<synchronous>, transform_indices = @transform_12, window_bounds = array<i64: 4, 32>}, {pipeline_mode = #tpu.pipeline_mode<synchronous>, transform_indices = @transform_13, window_bounds = array<i64: 1, 32>}, {pipeline_mode = #tpu.pipeline_mode<synchronous>, transform_indices = @transform_14, window_bounds = array<i64: 32, 1>}, {transform_indices = @transform_15, window_bounds = array<i64: 1, 32, 4>}, {transform_indices = @transform_16, window_bounds = array<i64: 1, 32, 1>}, {pipeline_mode = #tpu.pipeline_mode<synchronous>, transform_indices = @transform_17, window_bounds = array<i64: 32, 128>}]} {
    %c0_i32 = arith.constant 0 : i32
    %0 = arith.cmpi eq, %arg0, %c0_i32 : i32
    %1 = arith.extui %0 : i1 to i32
    %c0_i32_0 = arith.constant 0 : i32
    %2 = arith.cmpi ne, %1, %c0_i32_0 : i32
    scf.if %2 {
      %c0_93 = arith.constant 0 : index
      %c0_94 = arith.constant 0 : index
      %121 = vector.load %arg2[%c0_93, %c0_94] : memref<32x4xf32, #tpu.memory_space<vmem>>, vector<32x4xf32>
      %c0_95 = arith.constant 0 : index
      %c0_96 = arith.constant 0 : index
      %122 = vector.load %arg3[%c0_95, %c0_96] : memref<4x32xf32, #tpu.memory_space<vmem>>, vector<4x32xf32>
      %cst_97 = arith.constant dense<0.000000e+00> : vector<32x32xf32>
      %123 = tpu.matmul %121, %122, %cst_97 {dimension_numbers = #tpu.dot_dimension_numbers<[1], [0], [0], [1], [0, 0, 1, 1], [], []>} : vector<32x4xf32>, vector<4x32xf32>, vector<32x32xf32> -> vector<32x32xf32>
      %c0_98 = arith.constant 0 : index
      %c0_99 = arith.constant 0 : index
      %124 = vector.load %arg19[%c0_98, %c0_99] : memref<32x32xf32, #tpu.memory_space<vmem>>, vector<32x32xf32>
      tpu.vector_store %arg19[%c0_98, %c0_99], %123 {strides = array<i32>} : memref<32x32xf32, #tpu.memory_space<vmem>>, vector<32x32xf32>,
      %cst_100 = arith.constant 0.000000e+00 : f32
      %125 = vector.broadcast %cst_100 : f32 to vector<32x128xf32>
      %c0_101 = arith.constant 0 : index
      %c0_102 = arith.constant 0 : index
      %126 = vector.load %arg18[%c0_101, %c0_102] : memref<32x128xf32, #tpu.memory_space<vmem>>, vector<32x128xf32>
      tpu.vector_store %arg18[%c0_101, %c0_102], %125 {strides = array<i32>} : memref<32x128xf32, #tpu.memory_space<vmem>>, vector<32x128xf32>,
    } else {
    }
    %c0 = arith.constant 0 : index
    %c0_1 = arith.constant 0 : index
    %3 = vector.load %arg1[%c0, %c0_1] : memref<32x32xf32, #tpu.memory_space<vmem>>, vector<32x32xf32>
    %c0_2 = arith.constant 0 : index
    %c0_3 = arith.constant 0 : index
    %c0_4 = arith.constant 0 : index
    %4 = vector.load %arg16[%c0_2, %c0_3, %c0_4] : memref<1x32x4xf32, #tpu.memory_space<vmem>>, vector<1x32x4xf32>
    %5 = vector.shape_cast %4 : vector<1x32x4xf32> to vector<32x4xf32>
    %c0_5 = arith.constant 0 : index
    %c0_6 = arith.constant 0 : index
    %c0_7 = arith.constant 0 : index
    %6 = vector.load %arg17[%c0_5, %c0_6, %c0_7] : memref<1x32x1xf32, #tpu.memory_space<vmem>>, vector<1x32x1xf32>
    %7 = vector.shape_cast %6 : vector<1x32x1xf32> to vector<32x1xf32>
    %c0_8 = arith.constant 0 : index
    %c0_9 = arith.constant 0 : index
    %8 = vector.load %arg19[%c0_8, %c0_9] : memref<32x32xf32, #tpu.memory_space<vmem>>, vector<32x32xf32>
    %c0_10 = arith.constant 0 : index
    %c0_11 = arith.constant 0 : index
    %c0_12 = arith.constant 0 : index
    %9 = vector.load %arg4[%c0_10, %c0_11, %c0_12] : memref<2x32x32xf32, #tpu.memory_space<vmem>>, vector<1x32x32xf32>
    %10 = vector.shape_cast %9 : vector<1x32x32xf32> to vector<32x32xf32>
    %c0_13 = arith.constant 0 : index
    %c0_14 = arith.constant 0 : index
    %c0_15 = arith.constant 0 : index
    %11 = vector.load %arg5[%c0_13, %c0_14, %c0_15] : memref<2x4x32xf32, #tpu.memory_space<vmem>>, vector<1x4x32xf32>
    %12 = vector.shape_cast %11 : vector<1x4x32xf32> to vector<4x32xf32>
    %c0_16 = arith.constant 0 : index
    %c0_17 = arith.constant 0 : index
    %c0_18 = arith.constant 0 : index
    %13 = vector.load %arg6[%c0_16, %c0_17, %c0_18] : memref<2x1x32xf32, #tpu.memory_space<vmem>>, vector<1x1x32xf32>
    %14 = vector.shape_cast %13 : vector<1x1x32xf32> to vector<1x32xf32>
    %cst = arith.constant dense<0.000000e+00> : vector<32x32xf32>
    %15 = tpu.matmul %8, %10, %cst {dimension_numbers = #tpu.dot_dimension_numbers<[1], [0], [0], [1], [0, 0, 1, 1], [], []>} : vector<32x32xf32>, vector<32x32xf32>, vector<32x32xf32> -> vector<32x32xf32>
    %cst_19 = arith.constant dense<0.000000e+00> : vector<32x32xf32>
    %16 = tpu.matmul %3, %15, %cst_19 {dimension_numbers = #tpu.dot_dimension_numbers<[1], [0], [0], [1], [0, 0, 1, 1], [], []>} : vector<32x32xf32>, vector<32x32xf32>, vector<32x32xf32> -> vector<32x32xf32>
    %cst_20 = arith.constant dense<0.000000e+00> : vector<32x32xf32>
    %17 = tpu.matmul %5, %12, %cst_20 {dimension_numbers = #tpu.dot_dimension_numbers<[1], [0], [0], [1], [0, 0, 1, 1], [], []>} : vector<32x4xf32>, vector<4x32xf32>, vector<32x32xf32> -> vector<32x32xf32>
    %18 = arith.addf %16, %17 : vector<32x32xf32>
    %19 = vector.broadcast %7 : vector<32x1xf32> to vector<32x32xf32>
    %20 = vector.broadcast %14 : vector<1x32xf32> to vector<32x32xf32>
    %21 = arith.mulf %19, %20 : vector<32x32xf32>
    %22 = arith.addf %18, %21 : vector<32x32xf32>
    %cst_21 = arith.constant 0.000000e+00 : f32
    %23 = vector.broadcast %cst_21 : f32 to vector<32x32xf32>
    %24 = arith.maximumf %22, %23 : vector<32x32xf32>
    %c1 = arith.constant 1 : index
    %c0_22 = arith.constant 0 : index
    %c0_23 = arith.constant 0 : index
    %25 = vector.load %arg4[%c1, %c0_22, %c0_23] : memref<2x32x32xf32, #tpu.memory_space<vmem>>, vector<1x32x32xf32>
    %26 = vector.shape_cast %25 : vector<1x32x32xf32> to vector<32x32xf32>
    %c1_24 = arith.constant 1 : index
    %c0_25 = arith.constant 0 : index
    %c0_26 = arith.constant 0 : index
    %27 = vector.load %arg5[%c1_24, %c0_25, %c0_26] : memref<2x4x32xf32, #tpu.memory_space<vmem>>, vector<1x4x32xf32>
    %28 = vector.shape_cast %27 : vector<1x4x32xf32> to vector<4x32xf32>
    %c1_27 = arith.constant 1 : index
    %c0_28 = arith.constant 0 : index
    %c0_29 = arith.constant 0 : index
    %29 = vector.load %arg6[%c1_27, %c0_28, %c0_29] : memref<2x1x32xf32, #tpu.memory_space<vmem>>, vector<1x1x32xf32>
    %30 = vector.shape_cast %29 : vector<1x1x32xf32> to vector<1x32xf32>
    %cst_30 = arith.constant dense<0.000000e+00> : vector<32x32xf32>
    %31 = tpu.matmul %24, %26, %cst_30 {dimension_numbers = #tpu.dot_dimension_numbers<[1], [0], [0], [1], [0, 0, 1, 1], [], []>} : vector<32x32xf32>, vector<32x32xf32>, vector<32x32xf32> -> vector<32x32xf32>
    %cst_31 = arith.constant dense<0.000000e+00> : vector<32x32xf32>
    %32 = tpu.matmul %3, %31, %cst_31 {dimension_numbers = #tpu.dot_dimension_numbers<[1], [0], [0], [1], [0, 0, 1, 1], [], []>} : vector<32x32xf32>, vector<32x32xf32>, vector<32x32xf32> -> vector<32x32xf32>
    %cst_32 = arith.constant dense<0.000000e+00> : vector<32x32xf32>
    %33 = tpu.matmul %5, %28, %cst_32 {dimension_numbers = #tpu.dot_dimension_numbers<[1], [0], [0], [1], [0, 0, 1, 1], [], []>} : vector<32x4xf32>, vector<4x32xf32>, vector<32x32xf32> -> vector<32x32xf32>
    %34 = arith.addf %32, %33 : vector<32x32xf32>
    %35 = vector.broadcast %7 : vector<32x1xf32> to vector<32x32xf32>
    %36 = vector.broadcast %30 : vector<1x32xf32> to vector<32x32xf32>
    %37 = arith.mulf %35, %36 : vector<32x32xf32>
    %38 = arith.addf %34, %37 : vector<32x32xf32>
    %cst_33 = arith.constant 0.000000e+00 : f32
    %39 = vector.broadcast %cst_33 : f32 to vector<32x32xf32>
    %40 = arith.maximumf %38, %39 : vector<32x32xf32>
    %c0_34 = arith.constant 0 : index
    %c0_35 = arith.constant 0 : index
    %c0_36 = arith.constant 0 : index
    %41 = vector.load %arg7[%c0_34, %c0_35, %c0_36] : memref<2x32x8xf32, #tpu.memory_space<vmem>>, vector<1x32x8xf32>
    %42 = vector.shape_cast %41 : vector<1x32x8xf32> to vector<32x8xf32>
    %c0_37 = arith.constant 0 : index
    %c0_38 = arith.constant 0 : index
    %43 = vector.load %arg10[%c0_37, %c0_38] : memref<4x8xf32, #tpu.memory_space<vmem>>, vector<4x8xf32>
    %c0_39 = arith.constant 0 : index
    %c0_40 = arith.constant 0 : index
    %c0_41 = arith.constant 0 : index
    %44 = vector.load %arg9[%c0_39, %c0_40, %c0_41] : memref<2x1x8xf32, #tpu.memory_space<vmem>>, vector<1x1x8xf32>
    %45 = vector.shape_cast %44 : vector<1x1x8xf32> to vector<1x8xf32>
    %cst_42 = arith.constant dense<0.000000e+00> : vector<32x8xf32>
    %46 = tpu.matmul %40, %42, %cst_42 {dimension_numbers = #tpu.dot_dimension_numbers<[1], [0], [0], [1], [0, 0, 1, 1], [], []>} : vector<32x32xf32>, vector<32x8xf32>, vector<32x8xf32> -> vector<32x8xf32>
    %cst_43 = arith.constant dense<0.000000e+00> : vector<32x8xf32>
    %47 = tpu.matmul %3, %46, %cst_43 {dimension_numbers = #tpu.dot_dimension_numbers<[1], [0], [0], [1], [0, 0, 1, 1], [], []>} : vector<32x32xf32>, vector<32x8xf32>, vector<32x8xf32> -> vector<32x8xf32>
    %cst_44 = arith.constant dense<0.000000e+00> : vector<32x8xf32>
    %48 = tpu.matmul %5, %43, %cst_44 {dimension_numbers = #tpu.dot_dimension_numbers<[1], [0], [0], [1], [0, 0, 1, 1], [], []>} : vector<32x4xf32>, vector<4x8xf32>, vector<32x8xf32> -> vector<32x8xf32>
    %49 = arith.addf %47, %48 : vector<32x8xf32>
    %50 = vector.broadcast %7 : vector<32x1xf32> to vector<32x8xf32>
    %51 = vector.broadcast %45 : vector<1x8xf32> to vector<32x8xf32>
    %52 = arith.mulf %50, %51 : vector<32x8xf32>
    %53 = arith.addf %49, %52 : vector<32x8xf32>
    %54 = math.tanh %53 : vector<32x8xf32>
    %c0_45 = arith.constant 0 : index
    %c0_46 = arith.constant 0 : index
    %c0_47 = arith.constant 0 : index
    %55 = vector.load %arg7[%c0_45, %c0_46, %c0_47] : memref<2x32x8xf32, #tpu.memory_space<vmem>>, vector<1x32x8xf32>
    %56 = vector.shape_cast %55 : vector<1x32x8xf32> to vector<32x8xf32>
    %c0_48 = arith.constant 0 : index
    %c0_49 = arith.constant 0 : index
    %c0_50 = arith.constant 0 : index
    %57 = vector.load %arg8[%c0_48, %c0_49, %c0_50] : memref<2x8x8xf32, #tpu.memory_space<vmem>>, vector<1x8x8xf32>
    %58 = vector.shape_cast %57 : vector<1x8x8xf32> to vector<8x8xf32>
    %c0_51 = arith.constant 0 : index
    %c0_52 = arith.constant 0 : index
    %c0_53 = arith.constant 0 : index
    %59 = vector.load %arg9[%c0_51, %c0_52, %c0_53] : memref<2x1x8xf32, #tpu.memory_space<vmem>>, vector<1x1x8xf32>
    %60 = vector.shape_cast %59 : vector<1x1x8xf32> to vector<1x8xf32>
    %cst_54 = arith.constant dense<0.000000e+00> : vector<32x8xf32>
    %61 = tpu.matmul %40, %56, %cst_54 {dimension_numbers = #tpu.dot_dimension_numbers<[1], [0], [0], [1], [0, 0, 1, 1], [], []>} : vector<32x32xf32>, vector<32x8xf32>, vector<32x8xf32> -> vector<32x8xf32>
    %cst_55 = arith.constant dense<0.000000e+00> : vector<32x8xf32>
    %62 = tpu.matmul %3, %61, %cst_55 {dimension_numbers = #tpu.dot_dimension_numbers<[1], [0], [0], [1], [0, 0, 1, 1], [], []>} : vector<32x32xf32>, vector<32x8xf32>, vector<32x8xf32> -> vector<32x8xf32>
    %cst_56 = arith.constant dense<0.000000e+00> : vector<32x8xf32>
    %63 = tpu.matmul %54, %58, %cst_56 {dimension_numbers = #tpu.dot_dimension_numbers<[1], [0], [0], [1], [0, 0, 1, 1], [], []>} : vector<32x8xf32>, vector<8x8xf32>, vector<32x8xf32> -> vector<32x8xf32>
    %64 = arith.addf %62, %63 : vector<32x8xf32>
    %65 = vector.broadcast %7 : vector<32x1xf32> to vector<32x8xf32>
    %66 = vector.broadcast %60 : vector<1x8xf32> to vector<32x8xf32>
    %67 = arith.mulf %65, %66 : vector<32x8xf32>
    %68 = arith.addf %64, %67 : vector<32x8xf32>
    %69 = math.tanh %68 : vector<32x8xf32>
    %c0_i32_57 = arith.constant 0 : i32
    %70 = arith.cmpi eq, %arg0, %c0_i32_57 : i32
    %71 = arith.extui %70 : i1 to i32
    %72 = arith.sitofp %71 : i32 to f32
    %73 = vector.broadcast %72 : f32 to vector<32x8xf32>
    %74 = arith.mulf %73, %69 : vector<32x8xf32>
    %cst_58 = arith.constant 1.000000e+00 : f32
    %75 = arith.subf %cst_58, %72 : f32
    %76 = vector.broadcast %75 : f32 to vector<32x8xf32>
    %77 = arith.mulf %76, %54 : vector<32x8xf32>
    %78 = arith.addf %74, %77 : vector<32x8xf32>
    %c1_59 = arith.constant 1 : index
    %c0_60 = arith.constant 0 : index
    %c0_61 = arith.constant 0 : index
    %79 = vector.load %arg7[%c1_59, %c0_60, %c0_61] : memref<2x32x8xf32, #tpu.memory_space<vmem>>, vector<1x32x8xf32>
    %80 = vector.shape_cast %79 : vector<1x32x8xf32> to vector<32x8xf32>
    %c1_62 = arith.constant 1 : index
    %c0_63 = arith.constant 0 : index
    %c0_64 = arith.constant 0 : index
    %81 = vector.load %arg8[%c1_62, %c0_63, %c0_64] : memref<2x8x8xf32, #tpu.memory_space<vmem>>, vector<1x8x8xf32>
    %82 = vector.shape_cast %81 : vector<1x8x8xf32> to vector<8x8xf32>
    %c1_65 = arith.constant 1 : index
    %c0_66 = arith.constant 0 : index
    %c0_67 = arith.constant 0 : index
    %83 = vector.load %arg9[%c1_65, %c0_66, %c0_67] : memref<2x1x8xf32, #tpu.memory_space<vmem>>, vector<1x1x8xf32>
    %84 = vector.shape_cast %83 : vector<1x1x8xf32> to vector<1x8xf32>
    %cst_68 = arith.constant dense<0.000000e+00> : vector<32x8xf32>
    %85 = tpu.matmul %40, %80, %cst_68 {dimension_numbers = #tpu.dot_dimension_numbers<[1], [0], [0], [1], [0, 0, 1, 1], [], []>} : vector<32x32xf32>, vector<32x8xf32>, vector<32x8xf32> -> vector<32x8xf32>
    %cst_69 = arith.constant dense<0.000000e+00> : vector<32x8xf32>
    %86 = tpu.matmul %3, %85, %cst_69 {dimension_numbers = #tpu.dot_dimension_numbers<[1], [0], [0], [1], [0, 0, 1, 1], [], []>} : vector<32x32xf32>, vector<32x8xf32>, vector<32x8xf32> -> vector<32x8xf32>
    %cst_70 = arith.constant dense<0.000000e+00> : vector<32x8xf32>
    %87 = tpu.matmul %78, %82, %cst_70 {dimension_numbers = #tpu.dot_dimension_numbers<[1], [0], [0], [1], [0, 0, 1, 1], [], []>} : vector<32x8xf32>, vector<8x8xf32>, vector<32x8xf32> -> vector<32x8xf32>
    %88 = arith.addf %86, %87 : vector<32x8xf32>
    %89 = vector.broadcast %7 : vector<32x1xf32> to vector<32x8xf32>
    %90 = vector.broadcast %84 : vector<1x8xf32> to vector<32x8xf32>
    %91 = arith.mulf %89, %90 : vector<32x8xf32>
    %92 = arith.addf %88, %91 : vector<32x8xf32>
    %93 = math.tanh %92 : vector<32x8xf32>
    %c0_71 = arith.constant 0 : index
    %c0_72 = arith.constant 0 : index
    %94 = vector.load %arg11[%c0_71, %c0_72] : memref<32x32xf32, #tpu.memory_space<vmem>>, vector<32x32xf32>
    %cst_73 = arith.constant dense<0.000000e+00> : vector<32x32xf32>
    %95 = tpu.matmul %40, %94, %cst_73 {dimension_numbers = #tpu.dot_dimension_numbers<[1], [0], [0], [1], [0, 0, 1, 1], [], []>} : vector<32x32xf32>, vector<32x32xf32>, vector<32x32xf32> -> vector<32x32xf32>
    %c0_74 = arith.constant 0 : index
    %c0_75 = arith.constant 0 : index
    %96 = vector.load %arg12[%c0_74, %c0_75] : memref<8x32xf32, #tpu.memory_space<vmem>>, vector<8x32xf32>
    %cst_76 = arith.constant dense<0.000000e+00> : vector<32x32xf32>
    %97 = tpu.matmul %93, %96, %cst_76 {dimension_numbers = #tpu.dot_dimension_numbers<[1], [0], [0], [1], [0, 0, 1, 1], [], []>} : vector<32x8xf32>, vector<8x32xf32>, vector<32x32xf32> -> vector<32x32xf32>
    %98 = arith.addf %95, %97 : vector<32x32xf32>
    %cst_77 = arith.constant dense<0.000000e+00> : vector<32x32xf32>
    %99 = tpu.matmul %3, %98, %cst_77 {dimension_numbers = #tpu.dot_dimension_numbers<[1], [0], [0], [1], [0, 0, 1, 1], [], []>} : vector<32x32xf32>, vector<32x32xf32>, vector<32x32xf32> -> vector<32x32xf32>
    %c0_78 = arith.constant 0 : index
    %c0_79 = arith.constant 0 : index
    %100 = vector.load %arg13[%c0_78, %c0_79] : memref<4x32xf32, #tpu.memory_space<vmem>>, vector<4x32xf32>
    %cst_80 = arith.constant dense<0.000000e+00> : vector<32x32xf32>
    %101 = tpu.matmul %5, %100, %cst_80 {dimension_numbers = #tpu.dot_dimension_numbers<[1], [0], [0], [1], [0, 0, 1, 1], [], []>} : vector<32x4xf32>, vector<4x32xf32>, vector<32x32xf32> -> vector<32x32xf32>
    %102 = arith.addf %99, %101 : vector<32x32xf32>
    %c0_81 = arith.constant 0 : index
    %c0_82 = arith.constant 0 : index
    %103 = vector.load %arg14[%c0_81, %c0_82] : memref<1x32xf32, #tpu.memory_space<vmem>>, vector<1x32xf32>
    %104 = vector.broadcast %7 : vector<32x1xf32> to vector<32x32xf32>
    %105 = vector.broadcast %103 : vector<1x32xf32> to vector<32x32xf32>
    %106 = arith.mulf %104, %105 : vector<32x32xf32>
    %107 = arith.addf %102, %106 : vector<32x32xf32>
    %cst_83 = arith.constant 0.000000e+00 : f32
    %108 = vector.broadcast %cst_83 : f32 to vector<32x32xf32>
    %109 = arith.maximumf %107, %108 : vector<32x32xf32>
    %c0_84 = arith.constant 0 : index
    %c0_85 = arith.constant 0 : index
    %110 = vector.load %arg19[%c0_84, %c0_85] : memref<32x32xf32, #tpu.memory_space<vmem>>, vector<32x32xf32>
    tpu.vector_store %arg19[%c0_84, %c0_85], %109 {strides = array<i32>} : memref<32x32xf32, #tpu.memory_space<vmem>>, vector<32x32xf32>,
    %c0_86 = arith.constant 0 : index
    %c0_87 = arith.constant 0 : index
    %111 = vector.load %arg15[%c0_86, %c0_87] : memref<32x1xf32, #tpu.memory_space<vmem>>, vector<32x1xf32>
    %cst_88 = arith.constant dense<0.000000e+00> : vector<32x1xf32>
    %112 = tpu.matmul %109, %111, %cst_88 {dimension_numbers = #tpu.dot_dimension_numbers<[1], [0], [0], [1], [0, 0, 1, 1], [], []>} : vector<32x32xf32>, vector<32x1xf32>, vector<32x1xf32> -> vector<32x1xf32>
    %113 = tpu.iota {dimensions = array<i32: 1>} : vector<32x128xi32>
    %114 = vector.broadcast %arg0 : i32 to vector<32x128xi32>
    %115 = arith.cmpi eq, %113, %114 : vector<32x128xi32>
    %c0_89 = arith.constant 0 : index
    %c0_90 = arith.constant 0 : index
    %116 = vector.load %arg18[%c0_89, %c0_90] : memref<32x128xf32, #tpu.memory_space<vmem>>, vector<32x128xf32>
    %117 = vector.shape_cast %112 : vector<32x1xf32> to vector<32x1xf32>
    %118 = vector.broadcast %117 : vector<32x1xf32> to vector<32x128xf32>
    %119 = arith.select %115, %118, %116 : vector<32x128xi1>, vector<32x128xf32>
    %c0_91 = arith.constant 0 : index
    %c0_92 = arith.constant 0 : index
    %120 = vector.load %arg18[%c0_91, %c0_92] : memref<32x128xf32, #tpu.memory_space<vmem>>, vector<32x128xf32>
    tpu.vector_store %arg18[%c0_91, %c0_92], %119 {strides = array<i32>} : memref<32x128xf32, #tpu.memory_space<vmem>>, vector<32x128xf32>,
    return
  }
  func.func @transform_0(%arg0: i32) -> (i32, i32) {
    %c0_i32 = arith.constant 0 : i32
    %c0_i32_0 = arith.constant 0 : i32
    %c0_i32_1 = arith.constant 0 : i32
    return %c0_i32, %c0_i32_0 : i32, i32
  }
  func.func @transform_1(%arg0: i32) -> (i32, i32) {
    %c0_i32 = arith.constant 0 : i32
    %c0_i32_0 = arith.constant 0 : i32
    %c0_i32_1 = arith.constant 0 : i32
    return %c0_i32, %c0_i32_0 : i32, i32
  }
  func.func @transform_2(%arg0: i32) -> (i32, i32) {
    %c0_i32 = arith.constant 0 : i32
    %c0_i32_0 = arith.constant 0 : i32
    %c0_i32_1 = arith.constant 0 : i32
    return %c0_i32, %c0_i32_0 : i32, i32
  }
  func.func @transform_3(%arg0: i32) -> (i32, i32, i32) {
    %c0_i32 = arith.constant 0 : i32
    %c0_i32_0 = arith.constant 0 : i32
    %c0_i32_1 = arith.constant 0 : i32
    %c0_i32_2 = arith.constant 0 : i32
    return %c0_i32, %c0_i32_0, %c0_i32_1 : i32, i32, i32
  }
  func.func @transform_4(%arg0: i32) -> (i32, i32, i32) {
    %c0_i32 = arith.constant 0 : i32
    %c0_i32_0 = arith.constant 0 : i32
    %c0_i32_1 = arith.constant 0 : i32
    %c0_i32_2 = arith.constant 0 : i32
    return %c0_i32, %c0_i32_0, %c0_i32_1 : i32, i32, i32
  }
  func.func @transform_5(%arg0: i32) -> (i32, i32, i32) {
    %c0_i32 = arith.constant 0 : i32
    %c0_i32_0 = arith.constant 0 : i32
    %c0_i32_1 = arith.constant 0 : i32
    %c0_i32_2 = arith.constant 0 : i32
    return %c0_i32, %c0_i32_0, %c0_i32_1 : i32, i32, i32
  }
  func.func @transform_6(%arg0: i32) -> (i32, i32, i32) {
    %c0_i32 = arith.constant 0 : i32
    %c0_i32_0 = arith.constant 0 : i32
    %c0_i32_1 = arith.constant 0 : i32
    %c0_i32_2 = arith.constant 0 : i32
    return %c0_i32, %c0_i32_0, %c0_i32_1 : i32, i32, i32
  }
  func.func @transform_7(%arg0: i32) -> (i32, i32, i32) {
    %c0_i32 = arith.constant 0 : i32
    %c0_i32_0 = arith.constant 0 : i32
    %c0_i32_1 = arith.constant 0 : i32
    %c0_i32_2 = arith.constant 0 : i32
    return %c0_i32, %c0_i32_0, %c0_i32_1 : i32, i32, i32
  }
  func.func @transform_8(%arg0: i32) -> (i32, i32, i32) {
    %c0_i32 = arith.constant 0 : i32
    %c0_i32_0 = arith.constant 0 : i32
    %c0_i32_1 = arith.constant 0 : i32
    %c0_i32_2 = arith.constant 0 : i32
    return %c0_i32, %c0_i32_0, %c0_i32_1 : i32, i32, i32
  }
  func.func @transform_9(%arg0: i32) -> (i32, i32) {
    %c0_i32 = arith.constant 0 : i32
    %c0_i32_0 = arith.constant 0 : i32
    %c0_i32_1 = arith.constant 0 : i32
    return %c0_i32, %c0_i32_0 : i32, i32
  }
  func.func @transform_10(%arg0: i32) -> (i32, i32) {
    %c0_i32 = arith.constant 0 : i32
    %c0_i32_0 = arith.constant 0 : i32
    %c0_i32_1 = arith.constant 0 : i32
    return %c0_i32, %c0_i32_0 : i32, i32
  }
  func.func @transform_11(%arg0: i32) -> (i32, i32) {
    %c0_i32 = arith.constant 0 : i32
    %c0_i32_0 = arith.constant 0 : i32
    %c0_i32_1 = arith.constant 0 : i32
    return %c0_i32, %c0_i32_0 : i32, i32
  }
  func.func @transform_12(%arg0: i32) -> (i32, i32) {
    %c0_i32 = arith.constant 0 : i32
    %c0_i32_0 = arith.constant 0 : i32
    %c0_i32_1 = arith.constant 0 : i32
    return %c0_i32, %c0_i32_0 : i32, i32
  }
  func.func @transform_13(%arg0: i32) -> (i32, i32) {
    %c0_i32 = arith.constant 0 : i32
    %c0_i32_0 = arith.constant 0 : i32
    %c0_i32_1 = arith.constant 0 : i32
    return %c0_i32, %c0_i32_0 : i32, i32
  }
  func.func @transform_14(%arg0: i32) -> (i32, i32) {
    %c0_i32 = arith.constant 0 : i32
    %c0_i32_0 = arith.constant 0 : i32
    %c0_i32_1 = arith.constant 0 : i32
    return %c0_i32, %c0_i32_0 : i32, i32
  }
  func.func @transform_15(%arg0: i32) -> (i32, i32, i32) {
    %c0_i32 = arith.constant 0 : i32
    %c0_i32_0 = arith.constant 0 : i32
    %c0_i32_1 = arith.constant 0 : i32
    return %arg0, %c0_i32, %c0_i32_0 : i32, i32, i32
  }
  func.func @transform_16(%arg0: i32) -> (i32, i32, i32) {
    %c0_i32 = arith.constant 0 : i32
    %c0_i32_0 = arith.constant 0 : i32
    %c0_i32_1 = arith.constant 0 : i32
    return %arg0, %c0_i32, %c0_i32_0 : i32, i32, i32
  }
  func.func @transform_17(%arg0: i32) -> (i32, i32) {
    %c0_i32 = arith.constant 0 : i32
    %c0_i32_0 = arith.constant 0 : i32
    %c0_i32_1 = arith.constant 0 : i32
    return %c0_i32, %c0_i32_0 : i32, i32
  }
}

</mosaic_0001>

<bundles_post_ra>
// kernel: forward.1
= control target key start
LH: loop header
LB: loop body
LE: loop exit
PB: predicated region body
PF: predicated region fallthrough
CT: control target
= control target key end

     0   :  { %s3431_s24 = smov 0   ;;  %s3844_s0 = inlined_call_operand.vmem [shape: f32[32,32], index: 0, kind: input, shape index: {}]   ;;  %s3845_s1 = inlined_call_operand.vmem [shape: f32[32,4], index: 1, kind: input, shape index: {}]   ;;  %s3846_s2 = inlined_call_operand.vmem [shape: f32[4,32], index: 2, kind: input, shape index: {}]   ;;  %s3847_s3 = inlined_call_operand.vmem [shape: f32[2,32,32], index: 3, kind: input, shape index: {}]   ;;  %s3848_s4 = inlined_call_operand.vmem [shape: f32[2,4,32], index: 4, kind: input, shape index: {}]   ;;  %s3849_s5 = inlined_call_operand.vmem [shape: f32[2,1,32], index: 5, kind: input, shape index: {}]   ;;  %s3850_s6 = inlined_call_operand.vmem [shape: f32[2,32,8], index: 6, kind: input, shape index: {}]   ;;  %s3851_s7 = inlined_call_operand.vmem [shape: f32[2,8,8], index: 7, kind: input, shape index: {}]   ;;  %s3852_s8 = inlined_call_operand.vmem [shape: f32[2,1,8], index: 8, kind: input, shape index: {}]   ;;  %s3853_s9 = inlined_call_operand.vmem [shape: f32[4,8], index: 9, kind: input, shape index: {}]   ;;  %s3854_s10 = inlined_call_operand.vmem [shape: f32[32,32], index: 10, kind: input, shape index: {}]   ;;  %s3855_s11 = inlined_call_operand.vmem [shape: f32[8,32], index: 11, kind: input, shape index: {}]   ;;  %s3856_s12 = inlined_call_operand.vmem [shape: f32[4,32], index: 12, kind: input, shape index: {}]   ;;  %s3857_s13 = inlined_call_operand.vmem [shape: f32[1,32], index: 13, kind: input, shape index: {}]   ;;  %s3858_s14 = inlined_call_operand.vmem [shape: f32[32,1], index: 14, kind: input, shape index: {}]   ;;  %s3859_s15 = inlined_call_operand.vmem [shape: f32[3,32,4], index: 15, kind: input, shape index: {}]   ;;  %s3860_s16 = inlined_call_operand.vmem [shape: f32[3,32,1], index: 16, kind: input, shape index: {}]   ;;  %s3861_s17 = inlined_call_operand.vmem [shape: f32[32,128], index: 17, kind: output, shape index: {}]  }
   0x1   :  { %3864 = sst [smem:[#allocation3_spill]] %s3844_s0 }
   0x2   :  { %3865 = sst [smem:[#allocation4_spill]] %s3845_s1 }
   0x3 LB: > { %s3437_s25 = sadd.s32 4294967295, %s3337_s24   ;;  %p2689_p0 = scmp.ge.s32.totalorder %s3337_s24, 1  ;;  %s3337_s24 = sphi %s3431_s24, %s27_s24  }
   0x4   : > { %p492_p1 = scmp.lt.s32.totalorder %s3337_s24, 4 }
   0x6   : > { %p493_p2 = pnand %p2689_p0, %p492_p1 }
   0x7   : > { %p544_p3 = scmp.lt.s32.totalorder (!%p493_p2), %s3437_s25, 2  ;;  %p554_p4 = scmp.eq.s32.totalorder (!%p493_p2), %s3437_s25, 0 }
   0x8   : > { %496 = sbr.rel (%p493_p2) target bundleno = 2851 (0xb23), region = 88  ;;  %p2694_p5 = scmp.ne.s32.totalorder (!%p493_p2), %s3437_s25, 0 }
   0xf   : > { %s545_s26 = scalar_select %p544_p3, %s3437_s25, 2 }
  0x10   : > { %557 = sbr.rel (%p2694_p5) target bundleno = 238 (0xee), region = 92  ;;  %v562_v0 = vld [vmem:[%s3846_s2] sm:$0xf] (!%p2694_p5)  ;;  %vm576_vm0 = vcmask (!%p2694_p5), 1043456   ;;  %s3866_s23 = sld [smem:[#allocation4_spill]] (!%p2694_p5)  ;;  %vm563_vm1 = vcmask (!%p2694_p5), 31744  }
  0x11   : > { %s2799_s27 = sshll.u32 %s545_s26, 5  ;;  %2937 = vmatprep.subr.msk.mxu0 (!%p2694_p5), %vm576_vm0, %v562_v0  ;;  %3265 = vmatprep.subr.msk.mxu1 (!%p2694_p5), %vm576_vm0, %v562_v0  ;;  %v3339_v5 = vmov (!%p2694_p5), 0.0   ;;  %vm665_vm2 = vcmask (!%p2694_p5), 261120  }
  0x12   : > { %s3447_s0 = scalar_lea.vmem %s3859_s15, %s2799_s27  ;;  %s3452_s19 = scalar_lea.vmem %s3860_s16, %s2799_s27  ;;  %2938 = vmatpush3.msk.msra.mxu0 (!%p2694_p5), %vm576_vm0, %v562_v0  ;;  %3266 = vmatpush3.msk.msra.mxu1 (!%p2694_p5), %vm576_vm0, %v562_v0  ;;  %670 = vst [vmem:[%s3861_s17] sm:$0xff] (!%p2694_p5), %v3339_v5  ;;  %671 = vst [vmem:[%s3861_s17 + $0x8] sm:$0xff] (!%p2694_p5), %v3339_v5 }
  0x13   : > { %672 = vst [vmem:[%s3861_s17 + $0x10] sm:$0xff] (!%p2694_p5), %v3339_v5  ;;  %673 = vst [vmem:[%s3861_s17 + $0x18] sm:$0xff] (!%p2694_p5), %v3339_v5 }
  0x16   : > { %v558_v1 = vld [vmem:[%s3866_s23] sm:$0xff] (!%p2694_p5)  ;;  %v560_v2 = vld [vmem:[%s3866_s23 + $0x10] sm:$0xff] (!%p2694_p5)  ;;  %v559_v3 = vld [vmem:[%s3866_s23 + $0x8] sm:$0xff] (!%p2694_p5) }
  0x17   : > { %v561_v4 = vld [vmem:[%s3866_s23 + $0x18] sm:$0xff]  ;;  %2939 = vmatprep.mubr.msk.f32.mxu0 %vm563_vm1, %v558_v1  ;;  %2942 = vmatprep.mubr.msk.f32.mxu1 %vm563_vm1, %v560_v2 }
  0x18   : > { %2940 = vmatmul.mubr.msk.f32.vlgmr.msra.gmra.mrb[0].mxu0 %vm563_vm1, %v559_v3  ;;  %2943 = vmatmul.mubr.msk.f32.vlgmr.msra.gmra.mrb[0].mxu1 %vm563_vm1, %v561_v4 }
  0xeb   : > { %v2941_v6 = vpop.f32.mrb[0].mxu0  ;;  %v2944_v7 = vpop.f32.mrb[0].mxu1 }
  0xec   : > { %667 = vst.msk [vmem:[#allocation2 + $0x8] sm:$0xff] %vm665_vm2, %v2941_v6  ;;  %669 = vst.msk [vmem:[#allocation2 + $0x18] sm:$0xff] %vm665_vm2, %v2944_v7  ;;  %v646_v8 = vpop.f32.mrb[1].mxu0  ;;  %v656_v9 = vpop.f32.mrb[1].mxu1 }
  0xed   : > { %666 = vst.msk [vmem:[#allocation2] sm:$0xff] %vm665_vm2, %v646_v8  ;;  %668 = vst.msk [vmem:[#allocation2 + $0x10] sm:$0xff] %vm665_vm2, %v656_v9 }
  0xee PF: > { %v690_v10 = vld [vmem:[%s3847_s3] sm:$0xff]  ;;  %v691_v11 = vld [vmem:[%s3847_s3 + $0x8] sm:$0xff]  ;;  %v692_v12 = vld [vmem:[%s3847_s3 + $0x10] sm:$0xff]  ;;  %vm696_vm3 = vcmask 261120   ;;  %vm807_vm4 = vcmask 1043456   ;;  %vm794_vm5 = vcmask 31744  }
  0xef   : > { %v3169_v13 = vpack.c.bf16 %v691_v11, %v690_v10  ;;  %v693_v14 = vld [vmem:[%s3847_s3 + $0x18] sm:$0xff]  ;;  %v694_v20 = vld [vmem:[%s3848_s4] sm:$0xf]  ;;  %v3509_v22 = vld [vmem:[%s3447_s0 + $0x8] sm:$0xff]  ;;  %s3867_s1 = sld [smem:[#allocation3_spill]]  ;;  %v3340_v28 = vmov 0  }
  0xf0   : > { %v3173_v16 = vpack.c.bf16 %v693_v14, %v692_v12  ;;  %2959 = vmatprep.subr.msk.mxu1 %vm807_vm4, %v694_v20  ;;  %v3503_v21 = vld [vmem:[%s3447_s0] sm:$0xff]  ;;  %v3514_v23 = vld [vmem:[%s3447_s0 + $0x10] sm:$0xff]  ;;  %v3517_v24 = vld [vmem:[%s3447_s0 + $0x18] sm:$0xff]  ;;  %3305 = vset.pattern.permute.xlu0 %v3340_v28  ;;  %vm1623_vm6 = vcmask 64512   ;;  %s1814_s0 = scalar_select %p554_p4, 1, 0 }
  0xf1   : > { %3170 = vmatprep.subr.bf16.mxu0 %v3169_v13  ;;  %2960 = vmatpush3.msk.msra.mxu1 %vm807_vm4, %v694_v20  ;;  %v682_v26 = vld [vmem:[%s3452_s19] sm:$0xff]  ;;  %v684_v27 = vld [vmem:[%s3452_s19 + $0x10] sm:$0xff]  ;;  %v683_v29 = vld [vmem:[%s3452_s19 + $0x8] sm:$0xff] }
  0xf2   : > { %3172 = vmatpush3.bf16.msra.mxu0 %v3169_v13  ;;  %2961 = vmatprep.mubr.msk.f32.mxu1 %vm794_vm5, %v3503_v21  ;;  %v685_v30 = vld [vmem:[%s3452_s19 + $0x18] sm:$0xff]  ;;  %v2714_v31 = vld [vmem:[%s3847_s3 + $0x20] sm:$0xff]  ;;  %v2715_v32 = vld [vmem:[%s3847_s3 + $0x28] sm:$0xff]  ;;  %s1815_s20 = scvt.s32.f32 %s1814_s0 }
  0xf3   : > { %3174 = vmatprep.subr.bf16.mxu0 %v3173_v16  ;;  %v687_v17 = vld [vmem:[#allocation2 + $0x8] sm:$0xff]  ;;  %v689_v19 = vld [vmem:[#allocation2 + $0x18] sm:$0xff]  ;;  %2962 = vmatmul.mubr.msk.f32.vlgmr.msra.gmra.mrb[0].mxu1 %vm794_vm5, %v3509_v22  ;;  %v3185_v33 = vpack.c.bf16 %v2715_v32, %v2714_v31  ;;  %v2716_v43 = vld [vmem:[%s3847_s3 + $0x30] sm:$0xff] }
  0xf4   : > { %v686_v15 = vld [vmem:[#allocation2] sm:$0xff]  ;;  %v688_v18 = vld [vmem:[#allocation2 + $0x10] sm:$0xff]  ;;  %2964 = vmatprep.mubr.msk.f32.mxu1 %vm794_vm5, %v3514_v23  ;;  %3306 = vset.pattern.permute.xlu1 %v3340_v28  ;;  %v2717_v44 = vld [vmem:[%s3847_s3 + $0x38] sm:$0xff]  ;;  %s1821_s21 = ssub.f32 1.0, %s1815_s20 }
  0xf5   : > { %2953 = vmatprep.mubr.msk.f32.mxu0 %vm696_vm3, %v686_v15  ;;  %v3526_v25 = vld [vmem:[%s3867_s1] sm:$0xff]  ;;  %995 = vperm.xlu0 %3305, %v682_v26   ;;  %v3543_v40 = vld [vmem:[%s3867_s1 + $0x8] sm:$0xff]  ;;  %v3548_v41 = vld [vmem:[%s3867_s1 + $0x10] sm:$0xff]  ;;  %v3189_v45 = vpack.c.bf16 %v2717_v44, %v2716_v43 }
  0xf6   : > { %3176 = vmatpush3.bf16.msra.mxu0 %v3173_v16  ;;  %1005 = vperm.xlu1 %3306, %v684_v27   ;;  %v3557_v42 = vld [vmem:[%s3867_s1 + $0x18] sm:$0xff]  ;;  %v2718_v46 = vld [vmem:[%s3848_s4 + $0x4] sm:$0xf]  ;;  %v2713_v50 = vld [vmem:[%s3849_s5] ss:$0 sm:$0xff] }
  0xf7   : > { %2965 = vmatmul.mubr.msk.f32.gmra.mrb[2].mxu1 %vm794_vm5, %v3517_v24  ;;  %3186 = vmatprep.subr.bf16.mxu0 %v3185_v33  ;;  %v1328_v4 = vld [vmem:[%s3850_s6] sm:$0xff]  ;;  %v1329_v5 = vld [vmem:[%s3850_s6 + $0x8] sm:$0xff]  ;;  %v1330_v13 = vld [vmem:[%s3850_s6 + $0x10] sm:$0xff] }
  0xf8   : > { %2975 = vmatprep.mubr.msk.f32.mxu1 %vm696_vm3, %v3526_v25  ;;  %v3201_v6 = vpack.c.bf16 %v1329_v5, %v1328_v4  ;;  %v1331_v14 = vld [vmem:[%s3850_s6 + $0x18] sm:$0xff]  ;;  %v1332_v16 = vld [vmem:[%s3853_s9] sm:$0xf] }
  0xf9   : > { %2954 = vmatmul.mubr.msk.f32.vlgmr.msra.gmra.mrb[0].mxu0 %vm696_vm3, %v687_v17  ;;  %1000 = vperm.xlu0 %3305, %v683_v29   ;;  %v3205_v15 = vpack.c.bf16 %v1331_v14, %v1330_v13  ;;  %v2733_v17 = vld [vmem:[%s3849_s5 + $0x1] ss:$0 sm:$0xff] }
  0xfa   : > { %2956 = vmatprep.mubr.msk.f32.mxu0 %vm696_vm3, %v688_v18  ;;  %1010 = vperm.xlu1 %3306, %v685_v30  }
  0xfb   : > { %3188 = vmatpush3.bf16.msra.mxu0 %v3185_v33 }
  0xfc   : > { %3190 = vmatprep.subr.bf16.mxu0 %v3189_v45 }
  0xfd   : > { %2957 = vmatmul.mubr.msk.f32.gmra.mrb[2].mxu0 %vm696_vm3, %v689_v19 }
  0xff   : > { %3192 = vmatpush3.bf16.msra.mxu0 %v3189_v45 }
 0x100   : > { %3202 = vmatprep.subr.bf16.mxu0 %v3201_v6 }
 0x174   : > { %v3582_v47 = vpop.permute.xlu0 %995 }
 0x175   : > { %v3584_v48 = vpop.permute.xlu1 %1005  ;;  %v1019_v54 = vmul.f32 %v2713_v50, %v3582_v47  ;;  %v1316_v20 = vmul.f32 %v2733_v17, %v3582_v47 }
 0x176   : > { %v1021_v61 = vmul.f32 %v2713_v50, %v3584_v48  ;;  %v1318_v32 = vmul.f32 %v2733_v17, %v3584_v48 }
 0x178   : > { %v3586_v49 = vpop.permute.xlu0 %1000 }
 0x179   : > { %v1020_v51 = vmul.f32 %v2713_v50, %v3586_v49  ;;  %v3592_v52 = vpop.permute.xlu1 %1010  ;;  %v1317_v18 = vmul.f32 %v2733_v17, %v3586_v49 }
 0x17a   : > { %v1022_v58 = vmul.f32 %v2713_v50, %v3592_v52  ;;  %v1319_v29 = vmul.f32 %v2733_v17, %v3592_v52  ;;  %v2757_v50 = vld [vmem:[%s3850_s6 + $0x28] sm:$0xff] }
 0x1cc   : > { %v2955_v34 = vpop.f32.mrb[0].mxu0 }
 0x1cd   : > { %v775_v35 = vpop.f32.mrb[1].mxu0 }
 0x1ce   : > { %v3177_v36 = vpack.c.bf16 %v2955_v34, %v775_v35 }
 0x1d0   : > { %v2958_v37 = vpop.f32.mrb[2].mxu0  ;;  %3178 = vmatprep.subr.bf16.mxu1 %v3177_v36 }
 0x1d1   : > { %v785_v38 = vpop.f32.mrb[3].mxu0  ;;  %3180 = vmatpush3.bf16.msra.mxu1 %v3177_v36 }
 0x1d2   : > { %v3181_v39 = vpack.c.bf16 %v2958_v37, %v785_v38 }
 0x1d4   : > { %3182 = vmatprep.subr.bf16.mxu1 %v3181_v39 }
 0x1d5   : > { %3184 = vmatpush3.bf16.msra.mxu1 %v3181_v39  ;;  %v1622_v39 = vld [vmem:[%s3851_s7] sm:$0xff] }
 0x1d6   : > { %2995 = vmatprep.subr.msk.mxu1 %vm807_vm4, %v2718_v46 }
 0x1d8   : > { %2976 = vmatmul.mubr.msk.f32.vlgmr.msra.gmra.mrb[0].mxu1 %vm696_vm3, %v3543_v40 }
 0x1d9   : > { %2978 = vmatprep.mubr.msk.f32.mxu1 %vm696_vm3, %v3548_v41  ;;  %2996 = vmatpush3.msk.msra.mxu1 %vm807_vm4, %v2718_v46  ;;  %v2756_v46 = vld [vmem:[%s3850_s6 + $0x20] sm:$0xff] }
 0x1dc   : > { %2979 = vmatmul.mubr.msk.f32.gmra.mrb[2].mxu1 %vm696_vm3, %v3557_v42 }
 0x1dd   : > { %2997 = vmatprep.mubr.msk.f32.mxu1 %vm794_vm5, %v3503_v21 }
 0x1e0   : > { %2998 = vmatmul.mubr.msk.f32.vlgmr.msra.gmra.mrb[4].mxu1 %vm794_vm5, %v3509_v22 }
 0x1e1   : > { %3000 = vmatprep.mubr.msk.f32.mxu1 %vm794_vm5, %v3514_v23 }
 0x1e4   : > { %3001 = vmatmul.mubr.msk.f32.gmra.mrb[6].mxu1 %vm794_vm5, %v3517_v24 }
 0x1e5   : > { %3011 = vmatprep.mubr.msk.f32.mxu1 %vm696_vm3, %v3526_v25 }
 0x2ab   : > { %v2977_v53 = vpop.f32.mrb[0].mxu1 }
 0x2ac   : > { %v1024_v55 = vadd.f32 %v2977_v53, %v1020_v51  ;;  %v974_v56 = vpop.f32.mrb[1].mxu1 }
 0x2ad   : > { %v1023_v57 = vadd.f32 %v1019_v54, %v974_v56  ;;  %v2758_v56 = vld [vmem:[%s3850_s6 + $0x30] sm:$0xff] }
 0x2ae   : > { %v1028_v62 = vmax.f32 %v1024_v55, 0.0  ;;  %v3225_v55 = vpack.c.bf16 %v2757_v50, %v2756_v46 }
 0x2af   : > { %v1027_v59 = vmax.f32 %v1023_v57, 0.0  ;;  %v2980_v60 = vpop.f32.mrb[2].mxu1  ;;  %v2759_v57 = vld [vmem:[%s3850_s6 + $0x38] sm:$0xff] }
 0x2b0   : > { %v1026_v63 = vadd.f32 %v2980_v60, %v1022_v58  ;;  %v984_v0 = vpop.f32.mrb[3].mxu1  ;;  %v3229_v58 = vpack.c.bf16 %v2759_v57, %v2758_v56 }
 0x2b1   : > { %v1025_v1 = vadd.f32 %v1021_v61, %v984_v0  ;;  %2989 = vmatprep.mubr.msk.f32.mxu0 %vm696_vm3, %v1027_v59  ;;  %v2747_v59 = vld [vmem:[%s3852_s8] ss:$0 sm:$0xff] }
 0x2b2   : > { %2990 = vmatmul.mubr.msk.f32.vlgmr.msra.gmra.mrb[4].mxu0 %vm696_vm3, %v1028_v62  ;;  %v1030_v3 = vmax.f32 %v1026_v63, 0.0  ;;  %v1611_v60 = vmul.f32 %v2747_v59, %v3586_v49  ;;  %v1610_v62 = vmul.f32 %v2747_v59, %v3582_v47  ;;  %v1612_v4 = vmul.f32 %v2747_v59, %v3584_v48 }
 0x2b3   : > { %v1029_v2 = vmax.f32 %v1025_v1, 0.0  ;;  %3204 = vmatpush3.bf16.msra.mxu0 %v3201_v6 }
 0x2b4   : > { %3206 = vmatprep.subr.bf16.mxu0 %v3205_v15 }
 0x2b5   : > { %2992 = vmatprep.mubr.msk.f32.mxu0 %vm696_vm3, %v1029_v2  ;;  %v1613_v2 = vmul.f32 %v2747_v59, %v3592_v52 }
 0x2b6   : > { %2993 = vmatmul.mubr.msk.f32.gmra.mrb[6].mxu0 %vm696_vm3, %v1030_v3 }
 0x2b7   : > { %3208 = vmatpush3.bf16.msra.mxu0 %v3205_v15 }
 0x2b8   : > { %3031 = vmatprep.subr.msk.mxu0 %vm807_vm4, %v1332_v16 }
 0x385   : > { %v2991_v7 = vpop.f32.mrb[4].mxu0 }
 0x386   : > { %v1118_v8 = vpop.f32.mrb[5].mxu0 }
 0x387   : > { %v3193_v9 = vpack.c.bf16 %v2991_v7, %v1118_v8 }
 0x389   : > { %v2994_v10 = vpop.f32.mrb[6].mxu0  ;;  %3194 = vmatprep.subr.bf16.mxu1 %v3193_v9 }
 0x38a   : > { %v1128_v11 = vpop.f32.mrb[7].mxu0  ;;  %3196 = vmatpush3.bf16.msra.mxu1 %v3193_v9 }
 0x38b   : > { %v3197_v12 = vpack.c.bf16 %v2994_v10, %v1128_v11 }
 0x38d   : > { %3198 = vmatprep.subr.bf16.mxu1 %v3197_v12 }
 0x38e   : > { %3200 = vmatpush3.bf16.msra.mxu1 %v3197_v12 }
 0x38f   : > { %3053 = vmatprep.subr.mxu1 %v1622_v39 }
 0x391   : > { %3012 = vmatmul.mubr.msk.f32.vlgmr.msra.gmra.mrb[4].mxu1 %vm696_vm3, %v3543_v40 }
 0x392   : > { %3014 = vmatprep.mubr.msk.f32.mxu1 %vm696_vm3, %v3548_v41  ;;  %3054 = vmatpush3.msra.mxu1 %v1622_v39 }
 0x395   : > { %3015 = vmatmul.mubr.msk.f32.gmra.mrb[6].mxu1 %vm696_vm3, %v3557_v42 }
 0x464   : > { %v3013_v19 = vpop.f32.mrb[4].mxu1 }
 0x465   : > { %v1321_v26 = vadd.f32 %v3013_v19, %v1317_v18  ;;  %v1291_v27 = vpop.f32.mrb[5].mxu1  ;;  %v2760_v18 = vld [vmem:[%s3851_s7 + $0x8] sm:$0xff] }
 0x466   : > { %v1320_v28 = vadd.f32 %v1316_v20, %v1291_v27 }
 0x467   : > { %v3632_v33 = vmax.f32 %v1321_v26, 0.0 }
 0x468   : > { %v3629_v30 = vmax.f32 %v1320_v28, 0.0  ;;  %v3016_v31 = vpop.f32.mrb[6].mxu1 }
 0x469   : > { %v1323_v34 = vadd.f32 %v3016_v31, %v1319_v29  ;;  %v1301_v35 = vpop.f32.mrb[7].mxu1 }
 0x46a   : > { %v1322_v36 = vadd.f32 %v1318_v32, %v1301_v35  ;;  %3025 = vmatprep.mubr.msk.f32.mxu0 %vm696_vm3, %v3629_v30  ;;  %v1816_v35 = vstv %s1815_s20 }
 0x46b   : > { %3026 = vmatmul.mubr.msk.f32.vlgmr.msra.gmra.mrb[8].mxu0 %vm696_vm3, %v3632_v33  ;;  %v3641_v38 = vmax.f32 %v1323_v34, 0.0  ;;  %v1822_v34 = vstv %s1821_s21 }
 0x46c   : > { %v3638_v37 = vmax.f32 %v1322_v36, 0.0  ;;  %3032 = vmatpush3.msk.msra.mxu0 %vm807_vm4, %v1332_v16 }
 0x46e   : > { %3028 = vmatprep.mubr.msk.f32.mxu0 %vm696_vm3, %v3638_v37 }
 0x46f   : > { %3029 = vmatmul.mubr.msk.f32.gmra.mrb[10].mxu0 %vm696_vm3, %v3641_v38 }
 0x470   : > { %3033 = vmatprep.mubr.msk.f32.mxu0 %vm794_vm5, %v3503_v21 }
 0x473   : > { %3034 = vmatmul.mubr.msk.f32.vlgmr.msra.gmra.mrb[12].mxu0 %vm794_vm5, %v3509_v22 }
 0x474   : > { %3036 = vmatprep.mubr.msk.f32.mxu0 %vm794_vm5, %v3514_v23 }
 0x477   : > { %3037 = vmatmul.mubr.msk.f32.gmra.mrb[14].mxu0 %vm794_vm5, %v3517_v24 }
 0x478   : > { %3047 = vmatprep.mubr.msk.f32.mxu0 %vm696_vm3, %v3526_v25 }
 0x53e   : > { %v3027_v43 = vpop.f32.mrb[8].mxu0 }
 0x53f   : > { %v1412_v44 = vpop.f32.mrb[9].mxu0 }
 0x540   : > { %v3209_v45 = vpack.c.bf16 %v3027_v43, %v1412_v44 }
 0x542   : > { %v3030_v51 = vpop.f32.mrb[10].mxu0  ;;  %3210 = vmatprep.subr.bf16.mxu0 %v3209_v45  ;;  %3218 = vmatprep.subr.bf16.mxu1 %v3209_v45 }
 0x543   : > { %v1422_v53 = vpop.f32.mrb[11].mxu0  ;;  %3212 = vmatpush3.bf16.msra.mxu0 %v3209_v45 }
 0x544   : > { %v3213_v54 = vpack.c.bf16 %v3030_v51, %v1422_v53 }
 0x546   : > { %3214 = vmatprep.subr.bf16.mxu0 %v3213_v54 }
 0x547   : > { %3216 = vmatpush3.bf16.msra.mxu0 %v3213_v54 }
 0x548   : > { %3226 = vmatprep.subr.bf16.mxu0 %v3225_v55 }
 0x54a   : > { %3048 = vmatmul.mubr.msk.f32.vlgmr.msra.gmra.mrb[12].mxu0 %vm696_vm3, %v3543_v40 }
 0x54b   : > { %3228 = vmatpush3.bf16.msra.mxu0 %v3225_v55  ;;  %3050 = vmatprep.mubr.msk.f32.mxu0 %vm696_vm3, %v3548_v41 }
 0x54c   : > { %3230 = vmatprep.subr.bf16.mxu0 %v3229_v58 }
 0x54e   : > { %3051 = vmatmul.mubr.msk.f32.gmra.mrb[14].mxu0 %vm696_vm3, %v3557_v42 }
 0x54f   : > { %3232 = vmatpush3.bf16.msra.mxu0 %v3229_v58  ;;  %3083 = vmatprep.mubr.msk.f32.mxu0 %vm696_vm3, %v3629_v30 }
 0x552   : > { %3084 = vmatmul.mubr.msk.f32.vlgmr.msra.gmra.mrb[16].mxu0 %vm696_vm3, %v3632_v33 }
 0x553   : > { %3086 = vmatprep.mubr.msk.f32.mxu0 %vm696_vm3, %v3638_v37 }
 0x556   : > { %3087 = vmatmul.mubr.msk.f32.gmra.mrb[18].mxu0 %vm696_vm3, %v3641_v38 }
 0x61d   : > { %v3049_v61 = vpop.f32.mrb[12].mxu0 }
 0x61e   : > { %v1615_v63 = vadd.f32 %v3049_v61, %v1611_v60  ;;  %v1585_v0 = vpop.f32.mrb[13].mxu0  ;;  %v2129_v61 = vld [vmem:[%s3855_s11] sm:$0xff] }
 0x61f   : > { %v1614_v1 = vadd.f32 %v1610_v62, %v1585_v0  ;;  %3111 = vmatprep.subr.mxu0 %v2129_v61 }
 0x620   : > { %3112 = vmatpush3.msra.mxu0 %v2129_v61 }
 0x621   : > { %3307 = vtanh.f32 %v1614_v1  ;;  %v3052_v3 = vpop.f32.mrb[14].mxu0  ;;  %v2774_v1 = vld [vmem:[%s3852_s8 + $0x1] ss:$0 sm:$0xff] }
 0x622   : > { %3309 = vtanh.f32 %v1615_v63  ;;  %v1617_v5 = vadd.f32 %v3052_v3, %v1613_v2  ;;  %v1595_v6 = vpop.f32.mrb[15].mxu0  ;;  %v2126_v63 = vld [vmem:[%s3854_s10 + $0x8] sm:$0xff] }
 0x623   : > { %v1616_v7 = vadd.f32 %v1612_v4, %v1595_v6 }
 0x625   : > { %3311 = vtanh.f32 %v1616_v7  ;;  %v3085_v8 = vpop.f32.mrb[16].mxu0 }
 0x626   : > { %3313 = vtanh.f32 %v1617_v5  ;;  %v1906_v9 = vpop.f32.mrb[17].mxu0 }
 0x627   : > { %v3233_v10 = vpack.c.bf16 %v3085_v8, %v1906_v9 }
 0x629   : > { %v3088_v11 = vpop.f32.mrb[18].mxu0 }
 0x62a   : > { %v1916_v12 = vpop.f32.mrb[19].mxu0 }
 0x62b   : > { %v3308_v13 = vpop.eup %3307  ;;  %v3237_v14 = vpack.c.bf16 %v3088_v11, %v1916_v12  ;;  %v2128_v11 = vld [vmem:[%s3854_s10 + $0x18] sm:$0xff] }
 0x62c   : > { %v3310_v15 = vpop.eup %3309  ;;  %3055 = vmatprep.mubr.msk.f32.mxu1 %vm1623_vm6, %v3308_v13  ;;  %v1823_v46 = vmul.f32 %v3308_v13, %v1822_v34 }
 0x62d   : > { %3056 = vmatmul.mubr.msk.f32.vlgmr.msra.gmra.mrb[8].mxu1 %vm1623_vm6, %v3310_v15  ;;  %v1824_v43 = vmul.f32 %v3310_v15, %v1822_v34 }
 0x62e   : > { %3220 = vmatpush3.bf16.msra.mxu1 %v3209_v45 }
 0x62f   : > { %v3312_v16 = vpop.eup %3311  ;;  %3222 = vmatprep.subr.bf16.mxu1 %v3213_v54 }
 0x630   : > { %v3314_v17 = vpop.eup %3313  ;;  %3058 = vmatprep.mubr.msk.f32.mxu1 %vm1623_vm6, %v3312_v16  ;;  %v1825_v58 = vmul.f32 %v3312_v16, %v1822_v34 }
 0x631   : > { %3059 = vmatmul.mubr.msk.f32.gmra.mrb[10].mxu1 %vm1623_vm6, %v3314_v17  ;;  %v1826_v56 = vmul.f32 %v3314_v17, %v1822_v34  ;;  %v2509_v17 = vld [vmem:[%s3858_s14] sm:$0xff] }
 0x632   : > { %3224 = vmatpush3.bf16.msra.mxu1 %v3213_v54  ;;  %3069 = vmatprep.mubr.msk.f32.mxu1 %vm696_vm3, %v3526_v25 }
 0x633   : > { %3089 = vmatprep.subr.mxu1 %v2760_v18 }
 0x635   : > { %3070 = vmatmul.mubr.msk.f32.vlgmr.msra.gmra.mrb[8].mxu1 %vm696_vm3, %v3543_v40 }
 0x636   : > { %3090 = vmatpush3.msra.mxu1 %v2760_v18  ;;  %3072 = vmatprep.mubr.msk.f32.mxu1 %vm696_vm3, %v3548_v41  ;;  %v2510_v18 = vld [vmem:[%s3858_s14 + $0x8] sm:$0xff] }
 0x637   : > { %3234 = vmatprep.subr.bf16.mxu1 %v3233_v10 }
 0x639   : > { %3073 = vmatmul.mubr.msk.f32.gmra.mrb[10].mxu1 %vm696_vm3, %v3557_v42 }
 0x708   : > { %v3071_v19 = vpop.f32.mrb[8].mxu1 }
 0x709   : > { %v1807_v20 = vadd.f32 %v3071_v19, %v1611_v60  ;;  %v1787_v26 = vpop.f32.mrb[9].mxu1  ;;  %v3257_v19 = vpack.c.bf16 %v2510_v18, %v2509_v17 }
 0x70a   : > { %v1806_v27 = vadd.f32 %v1787_v26, %v1610_v62  ;;  %v2125_v62 = vld [vmem:[%s3854_s10] sm:$0xff] }
 0x70b   : > { %3315 = vtanh.f32 %v1807_v20  ;;  %v3241_v0 = vpack.c.bf16 %v2126_v63, %v2125_v62 }
 0x70c   : > { %3317 = vtanh.f32 %v1806_v27  ;;  %v3074_v28 = vpop.f32.mrb[10].mxu1 }
 0x70d   : > { %v1809_v29 = vadd.f32 %v3074_v28, %v1613_v2  ;;  %v1797_v31 = vpop.f32.mrb[11].mxu1  ;;  %3242 = vmatprep.subr.bf16.mxu0 %v3241_v0  ;;  %v2114_v2 = vmul.f32 %v2774_v1, %v3586_v49  ;;  %v2512_v28 = vld [vmem:[%s3858_s14 + $0x18] sm:$0xff] }
 0x70e   : > { %v1808_v32 = vadd.f32 %v1797_v31, %v1612_v4  ;;  %v2113_v4 = vmul.f32 %v2774_v1, %v3582_v47 }
 0x70f   : > { %3319 = vtanh.f32 %v1809_v29 }
 0x710   : > { %3321 = vtanh.f32 %v1808_v32 }
 0x715   : > { %v3316_v36 = vpop.eup %3315 }
 0x716   : > { %v3318_v39 = vpop.eup %3317  ;;  %v1818_v44 = vmul.f32 %v3316_v36, %v1816_v35 }
 0x717   : > { %v1817_v45 = vmul.f32 %v3318_v39, %v1816_v35 }
 0x718   : > { %v1828_v50 = vadd.f32 %v1824_v43, %v1818_v44 }
 0x719   : > { %v3320_v51 = vpop.eup %3319  ;;  %v1827_v53 = vadd.f32 %v1823_v46, %v1817_v45 }
 0x71a   : > { %v3322_v54 = vpop.eup %3321  ;;  %v1820_v55 = vmul.f32 %v3320_v51, %v1816_v35 }
 0x71b   : > { %3091 = vmatprep.mubr.msk.f32.mxu1 %vm1623_vm6, %v1827_v53  ;;  %v1819_v57 = vmul.f32 %v3322_v54, %v1816_v35 }
 0x71c   : > { %3092 = vmatmul.mubr.msk.f32.vlgmr.msra.gmra.mrb[12].mxu1 %vm1623_vm6, %v1828_v50  ;;  %v1830_v59 = vadd.f32 %v1826_v56, %v1820_v55  ;;  %v2610_v55 = vlaneseq }
 0x71d   : > { %3236 = vmatpush3.bf16.msra.mxu1 %v3233_v10  ;;  %v1829_v60 = vadd.f32 %v1825_v58, %v1819_v57  ;;  %v2127_v10 = vld [vmem:[%s3854_s10 + $0x10] sm:$0xff]  ;;  %v2612_v57 = vstv %s3437_s25 }
 0x71e   : > { %3238 = vmatprep.subr.bf16.mxu1 %v3237_v14  ;;  %v3245_v13 = vpack.c.bf16 %v2128_v11, %v2127_v10  ;;  %v2611_v56 = vand.u32 127, %v2610_v55 }
 0x71f   : > { %3094 = vmatprep.mubr.msk.f32.mxu1 %vm1623_vm6, %v1829_v60  ;;  %v2614_v60 = vld [vmem:[%s3861_s17] sm:$0xff] }
 0x720   : > { %3095 = vmatmul.mubr.msk.f32.gmra.mrb[14].mxu1 %vm1623_vm6, %v1830_v59  ;;  %vm3805_vm7 = vcmp.eq.s32.totalorder %v2611_v56, %v2612_v57  ;;  %v2615_v59 = vld [vmem:[%s3861_s17 + $0x8] sm:$0xff] }
 0x721   : > { %3240 = vmatpush3.bf16.msra.mxu1 %v3237_v14  ;;  %3105 = vmatprep.mubr.msk.f32.mxu1 %vm696_vm3, %v3526_v25 }
 0x724   : > { %3106 = vmatmul.mubr.msk.f32.vlgmr.msra.gmra.mrb[12].mxu1 %vm696_vm3, %v3543_v40 }
 0x725   : > { %3108 = vmatprep.mubr.msk.f32.mxu1 %vm696_vm3, %v3548_v41 }
 0x728   : > { %3109 = vmatmul.mubr.msk.f32.gmra.mrb[14].mxu1 %vm696_vm3, %v3557_v42 }
 0x729   : > { %3135 = vmatprep.mubr.msk.f32.mxu1 %vm794_vm5, %v3503_v21  ;;  %v2312_v21 = vld [vmem:[%s3856_s12] sm:$0xf] }
 0x72a   : > { %3133 = vmatprep.subr.msk.mxu1 %vm807_vm4, %v2312_v21 }
 0x72b   : > { %3134 = vmatpush3.msk.msra.mxu1 %vm807_vm4, %v2312_v21  ;;  %v2617_v21 = vld [vmem:[%s3861_s17 + $0x18] sm:$0xff] }
 0x72c   : > { %3136 = vmatmul.mubr.msk.f32.vlgmr.msra.gmra.mrb[16].mxu1 %vm794_vm5, %v3509_v22 }
 0x72d   : > { %3138 = vmatprep.mubr.msk.f32.mxu1 %vm794_vm5, %v3514_v23  ;;  %v2116_v23 = vmul.f32 %v2774_v1, %v3592_v52 }
 0x730   : > { %3139 = vmatmul.mubr.msk.f32.gmra.mrb[18].mxu1 %vm794_vm5, %v3517_v24  ;;  %v2115_v24 = vmul.f32 %v2774_v1, %v3584_v48  ;;  %v2616_v1 = vld [vmem:[%s3861_s17 + $0x10] sm:$0xff] }
 0x731   : > { %3149 = vmatprep.mubr.msk.f32.mxu1 %vm696_vm3, %v3526_v25 }
 0x7f7   : > { %v3107_v3 = vpop.f32.mrb[12].mxu1 }
 0x7f8   : > { %v2118_v5 = vadd.f32 %v3107_v3, %v2114_v2  ;;  %v2088_v22 = vpop.f32.mrb[13].mxu1 }
 0x7f9   : > { %v2117_v6 = vadd.f32 %v2113_v4, %v2088_v22 }
 0x7fb   : > { %3323 = vtanh.f32 %v2117_v6  ;;  %v3110_v7 = vpop.f32.mrb[14].mxu1 }
 0x7fc   : > { %3325 = vtanh.f32 %v2118_v5  ;;  %v2120_v25 = vadd.f32 %v3110_v7, %v2116_v23  ;;  %v2098_v8 = vpop.f32.mrb[15].mxu1 }
 0x7fd   : > { %v2119_v9 = vadd.f32 %v2115_v24, %v2098_v8 }
 0x7ff   : > { %3327 = vtanh.f32 %v2119_v9 }
 0x800   : > { %3329 = vtanh.f32 %v2120_v25 }
 0x805   : > { %v3324_v12 = vpop.eup %3323 }
 0x806   : > { %v3326_v14 = vpop.eup %3325  ;;  %3113 = vmatprep.mubr.msk.f32.mxu0 %vm1623_vm6, %v3324_v12 }
 0x807   : > { %3114 = vmatmul.mubr.msk.f32.vlgmr.msra.gmra.mrb[20].mxu0 %vm1623_vm6, %v3326_v14 }
 0x808   : > { %3244 = vmatpush3.bf16.msra.mxu0 %v3241_v0 }
 0x809   : > { %v3328_v15 = vpop.eup %3327  ;;  %3246 = vmatprep.subr.bf16.mxu0 %v3245_v13 }
 0x80a   : > { %v3330_v16 = vpop.eup %3329  ;;  %3116 = vmatprep.mubr.msk.f32.mxu0 %vm1623_vm6, %v3328_v15 }
 0x80b   : > { %3117 = vmatmul.mubr.msk.f32.gmra.mrb[22].mxu0 %vm1623_vm6, %v3330_v16 }
 0x80c   : > { %3248 = vmatpush3.bf16.msra.mxu0 %v3245_v13  ;;  %3127 = vmatprep.mubr.msk.f32.mxu0 %vm696_vm3, %v3629_v30 }
 0x80d   : > { %3258 = vmatprep.subr.bf16.mxu0 %v3257_v19 }
 0x80f   : > { %3128 = vmatmul.mubr.msk.f32.vlgmr.msra.gmra.mrb[20].mxu0 %vm696_vm3, %v3632_v33 }
 0x810   : > { %3130 = vmatprep.mubr.msk.f32.mxu0 %vm696_vm3, %v3638_v37  ;;  %3260 = vmatpush3.bf16.msra.mxu0 %v3257_v19 }
 0x813   : > { %3131 = vmatmul.mubr.msk.f32.gmra.mrb[22].mxu0 %vm696_vm3, %v3641_v38  ;;  %v2511_v38 = vld [vmem:[%s3858_s14 + $0x10] sm:$0xff] }
 0x814   : > { %v3261_v29 = vpack.c.bf16 %v2512_v28, %v2511_v38 }
 0x816   : > { %3262 = vmatprep.subr.bf16.mxu0 %v3261_v29 }
 0x817   : > { %3264 = vmatpush3.bf16.msra.mxu0 %v3261_v29 }
 0x8e2   : > { %v3129_v30 = vpop.f32.mrb[20].mxu0 }
 0x8e3   : > { %v2293_v20 = vpop.f32.mrb[21].mxu0 }
 0x8e4   : > { %v3249_v33 = vpack.c.bf16 %v3129_v30, %v2293_v20 }
 0x8e6   : > { %v3132_v26 = vpop.f32.mrb[22].mxu0  ;;  %3250 = vmatprep.subr.bf16.mxu1 %v3249_v33 }
 0x8e7   : > { %v2303_v37 = vpop.f32.mrb[23].mxu0  ;;  %3252 = vmatpush3.bf16.msra.mxu1 %v3249_v33 }
 0x8e8   : > { %v3253_v27 = vpack.c.bf16 %v3132_v26, %v2303_v37 }
 0x8ea   : > { %3254 = vmatprep.subr.bf16.mxu1 %v3253_v27 }
 0x8eb   : > { %3256 = vmatpush3.bf16.msra.mxu1 %v3253_v27 }
 0x8ee   : > { %3150 = vmatmul.mubr.msk.f32.vlgmr.msra.gmra.mrb[16].mxu1 %vm696_vm3, %v3543_v40  ;;  %v2792_v40 = vld [vmem:[%s3857_s13] ss:$0 sm:$0xff] }
 0x8ef   : > { %3152 = vmatprep.mubr.msk.f32.mxu1 %vm696_vm3, %v3548_v41  ;;  %v2494_v41 = vmul.f32 %v2792_v40, %v3586_v49  ;;  %v2496_v39 = vmul.f32 %v2792_v40, %v3592_v52  ;;  %v2495_v45 = vmul.f32 %v2792_v40, %v3584_v48 }
 0x8f2   : > { %3153 = vmatmul.mubr.msk.f32.gmra.mrb[18].mxu1 %vm696_vm3, %v3557_v42  ;;  %v2493_v42 = vmul.f32 %v2792_v40, %v3582_v47 }
 0x9c1   : > { %v3151_v31 = vpop.f32.mrb[16].mxu1 }
 0x9c2   : > { %v2498_v32 = vadd.f32 %v3151_v31, %v2494_v41  ;;  %v2467_v34 = vpop.f32.mrb[17].mxu1 }
 0x9c3   : > { %v2497_v35 = vadd.f32 %v2493_v42, %v2467_v34 }
 0x9c4   : > { %v2502_v36 = vmax.f32 %v2498_v32, 0.0 }
 0x9c5   : > { %v2501_v43 = vmax.f32 %v2497_v35, 0.0  ;;  %v3154_v44 = vpop.f32.mrb[18].mxu1 }
 0x9c6   : > { %2506 = vst.msk [vmem:[#allocation2 + $0x8] sm:$0xff] %vm696_vm3, %v2502_v36  ;;  %v2500_v46 = vadd.f32 %v3154_v44, %v2496_v39  ;;  %v2477_v50 = vpop.f32.mrb[19].mxu1 }
 0x9c7   : > { %2505 = vst.msk [vmem:[#allocation2] sm:$0xff] %vm696_vm3, %v2501_v43  ;;  %v2499_v49 = vadd.f32 %v2495_v45, %v2477_v50  ;;  %3163 = vmatprep.mubr.msk.f32.mxu0 %vm696_vm3, %v2501_v43 }
 0x9c8   : > { %v2504_v47 = vmax.f32 %v2500_v46, 0.0  ;;  %3164 = vmatmul.mubr.msk.f32.vlgmr.msra.gmra.mrb[24].mxu0 %vm696_vm3, %v2502_v36 }
 0x9c9   : > { %v2503_v51 = vmax.f32 %v2499_v49, 0.0 }
 0x9ca   : > { %2508 = vst.msk [vmem:[#allocation2 + $0x18] sm:$0xff] %vm696_vm3, %v2504_v47 }
 0x9cb   : > { %2507 = vst.msk [vmem:[#allocation2 + $0x10] sm:$0xff] %vm696_vm3, %v2503_v51  ;;  %3166 = vmatprep.mubr.msk.f32.mxu0 %vm696_vm3, %v2503_v51 }
 0x9cc   : > { %3167 = vmatmul.mubr.msk.f32.gmra.mrb[26].mxu0 %vm696_vm3, %v2504_v47 }
 0xa9b   : > { %v3165_v48 = vpop.f32.mrb[24].mxu0 }
 0xa9c   : > { %2625 = vperm.xlu1 %3306, %v3165_v48   ;;  %v2591_v52 = vpop.f32.mrb[25].mxu0 }
 0xa9d   : > { %2620 = vperm.xlu0 %3305, %v2591_v52  }
 0xa9f   : > { %v3168_v53 = vpop.f32.mrb[26].mxu0 }
 0xaa0   : > { %2635 = vperm.xlu1 %3306, %v3168_v53   ;;  %v2601_v54 = vpop.f32.mrb[27].mxu0 }
 0xaa1   : > { %2630 = vperm.xlu0 %3305, %v2601_v54  }
 0xb1b   : > { %v2626_v61 = vpop.permute.xlu1 %2625 }
 0xb1c   : > { %v2639_v62 = vsel %vm3805_vm7, %v2626_v61, %v2615_v59  ;;  %v2621_v63 = vpop.permute.xlu0 %2620 }
 0xb1d   : > { %2643 = vst [vmem:[%s3861_s17 + $0x8] sm:$0xff] %v2639_v62  ;;  %v2638_v0 = vsel %vm3805_vm7, %v2621_v63, %v2614_v60 }
 0xb1e   : > { %2642 = vst [vmem:[%s3861_s17] sm:$0xff] %v2638_v0 }
 0xb1f   : > { %v2636_v2 = vpop.permute.xlu1 %2635 }
 0xb20   : > { %v2641_v3 = vsel %vm3805_vm7, %v2636_v2, %v2617_v21  ;;  %v2631_v4 = vpop.permute.xlu0 %2630 }
 0xb21   : > { %2645 = vst [vmem:[%s3861_s17 + $0x18] sm:$0xff] %v2641_v3  ;;  %v2640_v5 = vsel %vm3805_vm7, %v2631_v4, %v2616_v1 }
 0xb22   : > { %2644 = vst [vmem:[%s3861_s17 + $0x10] sm:$0xff] %v2640_v5 }
 0xb23 PF: > { %s27_s24 = sadd.s32 1, %s3337_s24  }
 0xb24   : > { %p24_p6 = scmp.ge.s32.totalorder %s27_s24, 5  }
 0xb26   :  { %26 = sbr.rel (!%p24_p6) target bundleno = 3 (0x3), region = 127 }

</bundles_post_ra>
